<compile_context>
chip_gen: v7x
topology: tpu7x:2x2x1
jax: 0.10.0
libtpu: 0.0.40
codegen_flags: <defaults>
</compile_context>

<pallas_src>
import functools

import jax
import jax.numpy as jnp
from jax import lax
from jax.experimental import pallas as pl
from jax.experimental.pallas import tpu as pltpu

LRELU_SLOPE = 0.01   # torch.nn.LeakyReLU default
IN_EPS = 1e-5        # torch.nn.InstanceNorm2d default


def _conv_layer(src_pad_ref, patch_ref, wmat_ref, mask_l, mask_r, C, H2, W2):
    """One Conv2d(3x3, pad=1) + bias + InstanceNorm + LeakyReLU, fully in VMEM.

    src_pad_ref: (C, N + 2*(W2+1)) flat image, rows zero-padded top/bottom, data at
                 lane offset W2+1 (row-major over (H2, W2)).
    patch_ref:   (9*C + 1, N) im2col scratch (last row = ones -> folds bias).
    wmat_ref:    (Cout, 9*C + 1) weight with bias as the last column.
    mask_l/r:    (1, N) {0,1} column-boundary masks for the kx=0 / kx=2 taps.
    Returns (Cout, N) f32.
    """
    N = H2 * W2
    K = 9 * C
    # ---- build im2col patches: each 3x3 tap is a contiguous slice of the
    #      row-padded flat image (start = ky*W2 + kx), column OOB handled by masks.
    for ky in range(3):
        for kx in range(3):
            t = ky * 3 + kx
            start = ky * W2 + kx
            win = src_pad_ref[:, start:start + N]            # (C, N)
            if kx == 0:
                win = win * mask_l
            elif kx == 2:
                win = win * mask_r
            patch_ref[t * C:(t + 1) * C, :] = win
    patch_ref[K:K + 1, :] = jnp.ones((1, N), jnp.float32)    # bias row

    # ---- single MXU matmul: (Cout, K+1) x (K+1, N) -> (Cout, N), lane-dense.
    acc = jnp.dot(wmat_ref[...], patch_ref[...],
                  preferred_element_type=jnp.float32)

    # ---- InstanceNorm2d (affine=False), one-pass stats per (instance, channel).
    inv_n = 1.0 / float(N)
    s = jnp.sum(acc, axis=1, keepdims=True)
    ss = jnp.sum(acc * acc, axis=1, keepdims=True)
    mean = s * inv_n
    var = ss * inv_n - mean * mean
    y = (acc - mean) * lax.rsqrt(var + IN_EPS)

    # ---- LeakyReLU(0.01)
    return jnp.where(y >= 0, y, LRELU_SLOPE * y)


def _up_in_fused_kernel(x2_ref, x1_ref, w1_ref, w2_ref, ml_ref, mr_ref,
                        o_ref, xpf, p1, ypf, p2, *, H2, W2):
    # x2_ref: (1, C1, N)  skip connection (first C1 channels of the concat)
    # x1_ref: (1, C1, N)  upsampled-and-diff-padded x1 (next C1 channels)
    # w1_ref: (Cout, 9*Cin + 1)   w2_ref: (Cout, 9*Cout + 1)
    # o_ref : (1, Cout, N)  (directly NCHW-flat)
    C1 = x2_ref.shape[1]
    Cin = 2 * C1
    Cout = o_ref.shape[1]
    N = H2 * W2
    pad = W2 + 1                      # flat padding on each side (one row + 1 elem)

    mask_l = ml_ref[...]
    mask_r = mr_ref[...]

    # ---- stage conv1 input: channel concat [x2; x1] + zero row-pad bands.
    xpf[0:C1, pad:pad + N] = x2_ref[0]
    xpf[C1:Cin, pad:pad + N] = x1_ref[0]
    zpad1 = jnp.zeros((Cin, pad), jnp.float32)
    xpf[:, 0:pad] = zpad1
    xpf[:, pad + N:pad + N + pad] = zpad1

    # ---- conv1 + InstanceNorm + LeakyReLU
    y1 = _conv_layer(xpf, p1, w1_ref, mask_l, mask_r, Cin, H2, W2)   # (Cout, N)

    # ---- stage conv2 input (intermediate stays in VMEM, never hits HBM)
    ypf[:, pad:pad + N] = y1
    zpad2 = jnp.zeros((Cout, pad), jnp.float32)
    ypf[:, 0:pad] = zpad2
    ypf[:, pad + N:pad + N + pad] = zpad2

    # ---- conv2 + InstanceNorm + LeakyReLU
    y2 = _conv_layer(ypf, p2, w2_ref, mask_l, mask_r, Cout, H2, W2)  # (Cout, N)

    o_ref[0] = y2


def upsample_bilinear_x2_align_corners(x_nchw):
    """nn.Upsample(scale_factor=2, mode='bilinear', align_corners=True) — wrapper glue."""
    B, C, H, W = x_nchw.shape
    Ho, Wo = 2 * H, 2 * W

    def coords(n_in, n_out):
        if n_in == 1:
            src = jnp.zeros((n_out,), jnp.float32)
        else:
            src = jnp.arange(n_out, dtype=jnp.float32) * (n_in - 1) / (n_out - 1)
        i0 = jnp.clip(jnp.floor(src).astype(jnp.int32), 0, n_in - 1)
        i1 = jnp.clip(i0 + 1, 0, n_in - 1)
        frac = src - i0.astype(jnp.float32)
        return i0, i1, frac

    hi0, hi1, hf = coords(H, Ho)
    wi0, wi1, wf = coords(W, Wo)
    xh = (x_nchw[:, :, hi0, :] * (1.0 - hf)[None, None, :, None]
          + x_nchw[:, :, hi1, :] * hf[None, None, :, None])
    xo = (xh[:, :, :, wi0] * (1.0 - wf)[None, None, None, :]
          + xh[:, :, :, wi1] * wf[None, None, None, :])
    return xo


def _pack_weight(w, b):
    """(3,3,Cin,Cout) conv weight + (Cout,) bias -> (Cout, 9*Cin + 1) matmul weight.

    NOTE: PyTorch-trained weights come as (Cout, Cin, kH, kW) and would need to be
    transposed to (kH, kW, Cin, Cout) before calling this.
    """
    kh, kw, cin, cout = w.shape
    wm = jnp.transpose(w, (3, 0, 1, 2)).reshape(cout, kh * kw * cin)
    return jnp.concatenate([wm, b.reshape(cout, 1)], axis=1).astype(jnp.float32)


def init_up_in_params(key, in_ch, out_ch):
    k1, k2, k3, k4 = jax.random.split(key, 4)
    fan1 = 3 * 3 * in_ch
    fan2 = 3 * 3 * out_ch
    return {
        "w1": jax.random.normal(k1, (3, 3, in_ch, out_ch), jnp.float32) / jnp.sqrt(fan1),
        "b1": jax.random.normal(k2, (out_ch,), jnp.float32) * 0.01,
        "w2": jax.random.normal(k3, (3, 3, out_ch, out_ch), jnp.float32) / jnp.sqrt(fan2),
        "b2": jax.random.normal(k4, (out_ch,), jnp.float32) * 0.01,
    }


def up_in_forward(params, x1, x2):
    """up_in.forward: x1 (B, in_ch//2, H, W), x2 (B, in_ch//2, ~2H, ~2W) — NCHW in/out."""
    B, C1, _, _ = x1.shape

    # Bilinear x2 (align_corners=True) + F.pad to x2's spatial size (wrapper glue).
    x1u = upsample_bilinear_x2_align_corners(x1)
    diffY = x2.shape[2] - x1u.shape[2]
    diffX = x2.shape[3] - x1u.shape[3]
    if diffY != 0 or diffX != 0:
        x1u = jnp.pad(x1u, ((0, 0), (0, 0),
                            (diffY // 2, diffY - diffY // 2),
                            (diffX // 2, diffX - diffX // 2)))

    _, _, H2, W2 = x2.shape
    N = H2 * W2
    Cin = 2 * C1
    Cout = params["w1"].shape[-1]
    K1 = 9 * Cin
    K2 = 9 * Cout
    NP = N + 2 * (W2 + 1)            # flat length with row padding (+1 halo each end)

    # Free, contiguous reshapes to the kernel's channels-first flat layout.
    x2f = x2.reshape(B, C1, N).astype(jnp.float32)
    x1f = x1u.reshape(B, C1, N).astype(jnp.float32)

    # Weights with bias folded in as the last K column.
    w1m = _pack_weight(params["w1"], params["b1"])   # (Cout, K1+1)
    w2m = _pack_weight(params["w2"], params["b2"])   # (Cout, K2+1)

    # Column-boundary masks (kill the dx=-1 / dx=+1 taps at the left/right image edge).
    col = jnp.arange(N, dtype=jnp.int32) % W2
    mask_l = (col >= 1).astype(jnp.float32).reshape(1, N)
    mask_r = (col <= W2 - 2).astype(jnp.float32).reshape(1, N)

    kernel = functools.partial(_up_in_fused_kernel, H2=H2, W2=W2)

    cost = pl.CostEstimate(
        flops=2 * B * N * Cout * ((K1 + 1) + (K2 + 1)),
        transcendentals=2 * B * Cout,
        bytes_accessed=4 * (2 * B * C1 * N + B * Cout * N
                            + Cout * (K1 + 1) + Cout * (K2 + 1) + 2 * N))

    out_flat = pl.pallas_call(
        kernel,
        out_shape=jax.ShapeDtypeStruct((B, Cout, N), jnp.float32),
        grid_spec=pltpu.PrefetchScalarGridSpec(
            num_scalar_prefetch=0,
            grid=(B,),
            in_specs=[
                pl.BlockSpec((1, C1, N), lambda b: (b, 0, 0)),        # x2 (skip)
                pl.BlockSpec((1, C1, N), lambda b: (b, 0, 0)),        # x1 upsampled
                pl.BlockSpec((Cout, K1 + 1), lambda b: (0, 0)),       # conv1 weight+bias
                pl.BlockSpec((Cout, K2 + 1), lambda b: (0, 0)),       # conv2 weight+bias
                pl.BlockSpec((1, N), lambda b: (0, 0)),               # left-edge mask
                pl.BlockSpec((1, N), lambda b: (0, 0)),               # right-edge mask
            ],
            out_specs=pl.BlockSpec((1, Cout, N), lambda b: (b, 0, 0)),
            scratch_shapes=[
                pltpu.VMEM((Cin, NP), jnp.float32),      # padded flat conv1 input
                pltpu.VMEM((K1 + 1, N), jnp.float32),    # conv1 im2col (+ ones row)
                pltpu.VMEM((Cout, NP), jnp.float32),     # padded flat conv2 input
                pltpu.VMEM((K2 + 1, N), jnp.float32),    # conv2 im2col (+ ones row)
            ]),
        compiler_params=pltpu.CompilerParams(
            dimension_semantics=("parallel",)),
        cost_estimate=cost,
    )(x2f, x1f, w1m, w2m, mask_l, mask_r)

    # Output is already channels-first; just restore the spatial dims (free reshape).
    return out_flat.reshape(B, Cout, H2, W2)


if __name__ == "__main__":
    key = jax.random.PRNGKey(0)
    k_p, k_x1, k_x2 = jax.random.split(key, 3)

    B = 2
    in_ch, out_ch = 8, 4          # up_in(in_ch=8, out_ch=4, bilinear=True)
    H, W = 8, 8                   # x1 spatial; x2 is 2x that

    params = init_up_in_params(k_p, in_ch, out_ch)
    x1 = jax.random.normal(k_x1, (B, in_ch // 2, H, W), jnp.float32)
    x2 = jax.random.normal(k_x2, (B, in_ch // 2, 2 * H, 2 * W), jnp.float32)

    out = up_in_forward(params, x1, x2)
    out = jax.block_until_ready(out)
    assert out.shape == (B, out_ch, 2 * H, 2 * W), out.shape
    print("KERNEL_OK")
</pallas_src>

<mosaic_0001>
module attributes {stable_mosaic.version = 11 : i64} {
  func.func @_up_in_fused_kernel(%arg0: i32, %arg1: memref<1x4x256xf32, #tpu.memory_space<vmem>>, %arg2: memref<1x4x256xf32, #tpu.memory_space<vmem>>, %arg3: memref<4x73xf32, #tpu.memory_space<vmem>>, %arg4: memref<4x37xf32, #tpu.memory_space<vmem>>, %arg5: memref<1x256xf32, #tpu.memory_space<vmem>>, %arg6: memref<1x256xf32, #tpu.memory_space<vmem>>, %arg7: memref<1x4x256xf32, #tpu.memory_space<vmem>>, %arg8: memref<8x290xf32, #tpu.memory_space<vmem>>, %arg9: memref<73x256xf32, #tpu.memory_space<vmem>>, %arg10: memref<4x290xf32, #tpu.memory_space<vmem>>, %arg11: memref<37x256xf32, #tpu.memory_space<vmem>>) attributes {dimension_semantics = [#tpu.dimension_semantics<parallel>], iteration_bounds = array<i64: 2>, scalar_prefetch = 0 : i64, scratch_operands = 4 : i64, tpu.core_type = #tpu.core_type<tc>, window_params = [{transform_indices = @transform_0, window_bounds = array<i64: 1, 4, 256>}, {transform_indices = @transform_1, window_bounds = array<i64: 1, 4, 256>}, {pipeline_mode = #tpu.pipeline_mode<synchronous>, transform_indices = @transform_2, window_bounds = array<i64: 4, 73>}, {pipeline_mode = #tpu.pipeline_mode<synchronous>, transform_indices = @transform_3, window_bounds = array<i64: 4, 37>}, {pipeline_mode = #tpu.pipeline_mode<synchronous>, transform_indices = @transform_4, window_bounds = array<i64: 1, 256>}, {pipeline_mode = #tpu.pipeline_mode<synchronous>, transform_indices = @transform_5, window_bounds = array<i64: 1, 256>}, {transform_indices = @transform_6, window_bounds = array<i64: 1, 4, 256>}]} {
    %c0 = arith.constant 0 : index
    %c0_0 = arith.constant 0 : index
    %0 = vector.load %arg5[%c0, %c0_0] : memref<1x256xf32, #tpu.memory_space<vmem>>, vector<1x256xf32>
    %c0_1 = arith.constant 0 : index
    %c0_2 = arith.constant 0 : index
    %1 = vector.load %arg6[%c0_1, %c0_2] : memref<1x256xf32, #tpu.memory_space<vmem>>, vector<1x256xf32>
    %c0_3 = arith.constant 0 : index
    %c0_4 = arith.constant 0 : index
    %c0_5 = arith.constant 0 : index
    %2 = vector.load %arg1[%c0_3, %c0_4, %c0_5] : memref<1x4x256xf32, #tpu.memory_space<vmem>>, vector<1x4x256xf32>
    %3 = vector.shape_cast %2 : vector<1x4x256xf32> to vector<4x256xf32>
    %c0_6 = arith.constant 0 : index
    %c17 = arith.constant 17 : index
    %4 = vector.load %arg8[%c0_6, %c17] : memref<8x290xf32, #tpu.memory_space<vmem>>, vector<4x256xf32>
    tpu.vector_store %arg8[%c0_6, %c17], %3 {strides = array<i32>} : memref<8x290xf32, #tpu.memory_space<vmem>>, vector<4x256xf32>,
    %c0_7 = arith.constant 0 : index
    %c0_8 = arith.constant 0 : index
    %c0_9 = arith.constant 0 : index
    %5 = vector.load %arg2[%c0_7, %c0_8, %c0_9] : memref<1x4x256xf32, #tpu.memory_space<vmem>>, vector<1x4x256xf32>
    %6 = vector.shape_cast %5 : vector<1x4x256xf32> to vector<4x256xf32>
    %c4 = arith.constant 4 : index
    %c17_10 = arith.constant 17 : index
    %7 = vector.load %arg8[%c4, %c17_10] : memref<8x290xf32, #tpu.memory_space<vmem>>, vector<4x256xf32>
    tpu.vector_store %arg8[%c4, %c17_10], %6 {strides = array<i32>} : memref<8x290xf32, #tpu.memory_space<vmem>>, vector<4x256xf32>,
    %cst = arith.constant 0.000000e+00 : f32
    %8 = vector.broadcast %cst : f32 to vector<8x17xf32>
    %c0_11 = arith.constant 0 : index
    %c0_12 = arith.constant 0 : index
    %9 = vector.load %arg8[%c0_11, %c0_12] : memref<8x290xf32, #tpu.memory_space<vmem>>, vector<8x17xf32>
    tpu.vector_store %arg8[%c0_11, %c0_12], %8 {strides = array<i32>} : memref<8x290xf32, #tpu.memory_space<vmem>>, vector<8x17xf32>,
    %c0_13 = arith.constant 0 : index
    %c273 = arith.constant 273 : index
    %10 = vector.load %arg8[%c0_13, %c273] : memref<8x290xf32, #tpu.memory_space<vmem>>, vector<8x17xf32>
    tpu.vector_store %arg8[%c0_13, %c273], %8 {strides = array<i32>} : memref<8x290xf32, #tpu.memory_space<vmem>>, vector<8x17xf32>,
    %c0_14 = arith.constant 0 : index
    %c0_15 = arith.constant 0 : index
    %11 = vector.load %arg8[%c0_14, %c0_15] : memref<8x290xf32, #tpu.memory_space<vmem>>, vector<8x256xf32>
    %12 = vector.broadcast %0 : vector<1x256xf32> to vector<8x256xf32>
    %13 = arith.mulf %11, %12 : vector<8x256xf32>
    %c0_16 = arith.constant 0 : index
    %c0_17 = arith.constant 0 : index
    %14 = vector.load %arg9[%c0_16, %c0_17] : memref<73x256xf32, #tpu.memory_space<vmem>>, vector<8x256xf32>
    tpu.vector_store %arg9[%c0_16, %c0_17], %13 {strides = array<i32>} : memref<73x256xf32, #tpu.memory_space<vmem>>, vector<8x256xf32>,
    %c0_18 = arith.constant 0 : index
    %c1 = arith.constant 1 : index
    %15 = vector.load %arg8[%c0_18, %c1] : memref<8x290xf32, #tpu.memory_space<vmem>>, vector<8x256xf32>
    %c8 = arith.constant 8 : index
    %c0_19 = arith.constant 0 : index
    %16 = vector.load %arg9[%c8, %c0_19] : memref<73x256xf32, #tpu.memory_space<vmem>>, vector<8x256xf32>
    tpu.vector_store %arg9[%c8, %c0_19], %15 {strides = array<i32>} : memref<73x256xf32, #tpu.memory_space<vmem>>, vector<8x256xf32>,
    %c0_20 = arith.constant 0 : index
    %c2 = arith.constant 2 : index
    %17 = vector.load %arg8[%c0_20, %c2] : memref<8x290xf32, #tpu.memory_space<vmem>>, vector<8x256xf32>
    %18 = vector.broadcast %1 : vector<1x256xf32> to vector<8x256xf32>
    %19 = arith.mulf %17, %18 : vector<8x256xf32>
    %c16 = arith.constant 16 : index
    %c0_21 = arith.constant 0 : index
    %20 = vector.load %arg9[%c16, %c0_21] : memref<73x256xf32, #tpu.memory_space<vmem>>, vector<8x256xf32>
    tpu.vector_store %arg9[%c16, %c0_21], %19 {strides = array<i32>} : memref<73x256xf32, #tpu.memory_space<vmem>>, vector<8x256xf32>,
    %c0_22 = arith.constant 0 : index
    %c16_23 = arith.constant 16 : index
    %21 = vector.load %arg8[%c0_22, %c16_23] : memref<8x290xf32, #tpu.memory_space<vmem>>, vector<8x256xf32>
    %22 = vector.broadcast %0 : vector<1x256xf32> to vector<8x256xf32>
    %23 = arith.mulf %21, %22 : vector<8x256xf32>
    %c24 = arith.constant 24 : index
    %c0_24 = arith.constant 0 : index
    %24 = vector.load %arg9[%c24, %c0_24] : memref<73x256xf32, #tpu.memory_space<vmem>>, vector<8x256xf32>
    tpu.vector_store %arg9[%c24, %c0_24], %23 {strides = array<i32>} : memref<73x256xf32, #tpu.memory_space<vmem>>, vector<8x256xf32>,
    %c0_25 = arith.constant 0 : index
    %c17_26 = arith.constant 17 : index
    %25 = vector.load %arg8[%c0_25, %c17_26] : memref<8x290xf32, #tpu.memory_space<vmem>>, vector<8x256xf32>
    %c32 = arith.constant 32 : index
    %c0_27 = arith.constant 0 : index
    %26 = vector.load %arg9[%c32, %c0_27] : memref<73x256xf32, #tpu.memory_space<vmem>>, vector<8x256xf32>
    tpu.vector_store %arg9[%c32, %c0_27], %25 {strides = array<i32>} : memref<73x256xf32, #tpu.memory_space<vmem>>, vector<8x256xf32>,
    %c0_28 = arith.constant 0 : index
    %c18 = arith.constant 18 : index
    %27 = vector.load %arg8[%c0_28, %c18] : memref<8x290xf32, #tpu.memory_space<vmem>>, vector<8x256xf32>
    %28 = vector.broadcast %1 : vector<1x256xf32> to vector<8x256xf32>
    %29 = arith.mulf %27, %28 : vector<8x256xf32>
    %c40 = arith.constant 40 : index
    %c0_29 = arith.constant 0 : index
    %30 = vector.load %arg9[%c40, %c0_29] : memref<73x256xf32, #tpu.memory_space<vmem>>, vector<8x256xf32>
    tpu.vector_store %arg9[%c40, %c0_29], %29 {strides = array<i32>} : memref<73x256xf32, #tpu.memory_space<vmem>>, vector<8x256xf32>,
    %c0_30 = arith.constant 0 : index
    %c32_31 = arith.constant 32 : index
    %31 = vector.load %arg8[%c0_30, %c32_31] : memref<8x290xf32, #tpu.memory_space<vmem>>, vector<8x256xf32>
    %32 = vector.broadcast %0 : vector<1x256xf32> to vector<8x256xf32>
    %33 = arith.mulf %31, %32 : vector<8x256xf32>
    %c48 = arith.constant 48 : index
    %c0_32 = arith.constant 0 : index
    %34 = vector.load %arg9[%c48, %c0_32] : memref<73x256xf32, #tpu.memory_space<vmem>>, vector<8x256xf32>
    tpu.vector_store %arg9[%c48, %c0_32], %33 {strides = array<i32>} : memref<73x256xf32, #tpu.memory_space<vmem>>, vector<8x256xf32>,
    %c0_33 = arith.constant 0 : index
    %c33 = arith.constant 33 : index
    %35 = vector.load %arg8[%c0_33, %c33] : memref<8x290xf32, #tpu.memory_space<vmem>>, vector<8x256xf32>
    %c56 = arith.constant 56 : index
    %c0_34 = arith.constant 0 : index
    %36 = vector.load %arg9[%c56, %c0_34] : memref<73x256xf32, #tpu.memory_space<vmem>>, vector<8x256xf32>
    tpu.vector_store %arg9[%c56, %c0_34], %35 {strides = array<i32>} : memref<73x256xf32, #tpu.memory_space<vmem>>, vector<8x256xf32>,
    %c0_35 = arith.constant 0 : index
    %c34 = arith.constant 34 : index
    %37 = vector.load %arg8[%c0_35, %c34] : memref<8x290xf32, #tpu.memory_space<vmem>>, vector<8x256xf32>
    %38 = vector.broadcast %1 : vector<1x256xf32> to vector<8x256xf32>
    %39 = arith.mulf %37, %38 : vector<8x256xf32>
    %c64 = arith.constant 64 : index
    %c0_36 = arith.constant 0 : index
    %40 = vector.load %arg9[%c64, %c0_36] : memref<73x256xf32, #tpu.memory_space<vmem>>, vector<8x256xf32>
    tpu.vector_store %arg9[%c64, %c0_36], %39 {strides = array<i32>} : memref<73x256xf32, #tpu.memory_space<vmem>>, vector<8x256xf32>,
    %cst_37 = arith.constant 1.000000e+00 : f32
    %41 = vector.broadcast %cst_37 : f32 to vector<1x256xf32>
    %c72 = arith.constant 72 : index
    %c0_38 = arith.constant 0 : index
    %42 = vector.load %arg9[%c72, %c0_38] : memref<73x256xf32, #tpu.memory_space<vmem>>, vector<1x256xf32>
    tpu.vector_store %arg9[%c72, %c0_38], %41 {strides = array<i32>} : memref<73x256xf32, #tpu.memory_space<vmem>>, vector<1x256xf32>,
    %c0_39 = arith.constant 0 : index
    %c0_40 = arith.constant 0 : index
    %43 = vector.load %arg3[%c0_39, %c0_40] : memref<4x73xf32, #tpu.memory_space<vmem>>, vector<4x73xf32>
    %c0_41 = arith.constant 0 : index
    %c0_42 = arith.constant 0 : index
    %44 = vector.load %arg9[%c0_41, %c0_42] : memref<73x256xf32, #tpu.memory_space<vmem>>, vector<73x256xf32>
    %cst_43 = arith.constant dense<0.000000e+00> : vector<4x256xf32>
    %45 = tpu.matmul %43, %44, %cst_43 {dimension_numbers = #tpu.dot_dimension_numbers<[1], [0], [0], [1], [0, 0, 1, 1], [], []>} : vector<4x73xf32>, vector<73x256xf32>, vector<4x256xf32> -> vector<4x256xf32>
    %cst_44 = arith.constant dense<0.000000e+00> : vector<4xf32>
    %46 = vector.multi_reduction <add>, %45, %cst_44 [1] : vector<4x256xf32> to vector<4xf32>
    %47 = vector.shape_cast %46 : vector<4xf32> to vector<4x1xf32>
    %48 = arith.mulf %45, %45 : vector<4x256xf32>
    %cst_45 = arith.constant dense<0.000000e+00> : vector<4xf32>
    %49 = vector.multi_reduction <add>, %48, %cst_45 [1] : vector<4x256xf32> to vector<4xf32>
    %50 = vector.shape_cast %49 : vector<4xf32> to vector<4x1xf32>
    %cst_46 = arith.constant 3.906250e-03 : f32
    %51 = vector.broadcast %cst_46 : f32 to vector<4x1xf32>
    %52 = arith.mulf %47, %51 : vector<4x1xf32>
    %cst_47 = arith.constant 3.906250e-03 : f32
    %53 = vector.broadcast %cst_47 : f32 to vector<4x1xf32>
    %54 = arith.mulf %50, %53 : vector<4x1xf32>
    %55 = arith.mulf %52, %52 : vector<4x1xf32>
    %56 = arith.subf %54, %55 : vector<4x1xf32>
    %57 = vector.broadcast %52 : vector<4x1xf32> to vector<4x256xf32>
    %58 = arith.subf %45, %57 : vector<4x256xf32>
    %cst_48 = arith.constant 9.99999974E-6 : f32
    %59 = vector.broadcast %cst_48 : f32 to vector<4x1xf32>
    %60 = arith.addf %56, %59 : vector<4x1xf32>
    %61 = math.rsqrt %60 : vector<4x1xf32>
    %62 = vector.broadcast %61 : vector<4x1xf32> to vector<4x256xf32>
    %63 = arith.mulf %58, %62 : vector<4x256xf32>
    %cst_49 = arith.constant 0.000000e+00 : f32
    %64 = vector.broadcast %cst_49 : f32 to vector<4x256xf32>
    %65 = arith.cmpf oge, %63, %64 : vector<4x256xf32>
    %cst_50 = arith.constant 0.00999999977 : f32
    %66 = vector.broadcast %cst_50 : f32 to vector<4x256xf32>
    %67 = arith.mulf %66, %63 : vector<4x256xf32>
    %68 = arith.select %65, %63, %67 : vector<4x256xi1>, vector<4x256xf32>
    %c0_51 = arith.constant 0 : index
    %c17_52 = arith.constant 17 : index
    %69 = vector.load %arg10[%c0_51, %c17_52] : memref<4x290xf32, #tpu.memory_space<vmem>>, vector<4x256xf32>
    tpu.vector_store %arg10[%c0_51, %c17_52], %68 {strides = array<i32>} : memref<4x290xf32, #tpu.memory_space<vmem>>, vector<4x256xf32>,
    %cst_53 = arith.constant 0.000000e+00 : f32
    %70 = vector.broadcast %cst_53 : f32 to vector<4x17xf32>
    %c0_54 = arith.constant 0 : index
    %c0_55 = arith.constant 0 : index
    %71 = vector.load %arg10[%c0_54, %c0_55] : memref<4x290xf32, #tpu.memory_space<vmem>>, vector<4x17xf32>
    tpu.vector_store %arg10[%c0_54, %c0_55], %70 {strides = array<i32>} : memref<4x290xf32, #tpu.memory_space<vmem>>, vector<4x17xf32>,
    %c0_56 = arith.constant 0 : index
    %c273_57 = arith.constant 273 : index
    %72 = vector.load %arg10[%c0_56, %c273_57] : memref<4x290xf32, #tpu.memory_space<vmem>>, vector<4x17xf32>
    tpu.vector_store %arg10[%c0_56, %c273_57], %70 {strides = array<i32>} : memref<4x290xf32, #tpu.memory_space<vmem>>, vector<4x17xf32>,
    %c0_58 = arith.constant 0 : index
    %c0_59 = arith.constant 0 : index
    %73 = vector.load %arg10[%c0_58, %c0_59] : memref<4x290xf32, #tpu.memory_space<vmem>>, vector<4x256xf32>
    %74 = vector.broadcast %0 : vector<1x256xf32> to vector<4x256xf32>
    %75 = arith.mulf %73, %74 : vector<4x256xf32>
    %c0_60 = arith.constant 0 : index
    %c0_61 = arith.constant 0 : index
    %76 = vector.load %arg11[%c0_60, %c0_61] : memref<37x256xf32, #tpu.memory_space<vmem>>, vector<4x256xf32>
    tpu.vector_store %arg11[%c0_60, %c0_61], %75 {strides = array<i32>} : memref<37x256xf32, #tpu.memory_space<vmem>>, vector<4x256xf32>,
    %c0_62 = arith.constant 0 : index
    %c1_63 = arith.constant 1 : index
    %77 = vector.load %arg10[%c0_62, %c1_63] : memref<4x290xf32, #tpu.memory_space<vmem>>, vector<4x256xf32>
    %c4_64 = arith.constant 4 : index
    %c0_65 = arith.constant 0 : index
    %78 = vector.load %arg11[%c4_64, %c0_65] : memref<37x256xf32, #tpu.memory_space<vmem>>, vector<4x256xf32>
    tpu.vector_store %arg11[%c4_64, %c0_65], %77 {strides = array<i32>} : memref<37x256xf32, #tpu.memory_space<vmem>>, vector<4x256xf32>,
    %c0_66 = arith.constant 0 : index
    %c2_67 = arith.constant 2 : index
    %79 = vector.load %arg10[%c0_66, %c2_67] : memref<4x290xf32, #tpu.memory_space<vmem>>, vector<4x256xf32>
    %80 = vector.broadcast %1 : vector<1x256xf32> to vector<4x256xf32>
    %81 = arith.mulf %79, %80 : vector<4x256xf32>
    %c8_68 = arith.constant 8 : index
    %c0_69 = arith.constant 0 : index
    %82 = vector.load %arg11[%c8_68, %c0_69] : memref<37x256xf32, #tpu.memory_space<vmem>>, vector<4x256xf32>
    tpu.vector_store %arg11[%c8_68, %c0_69], %81 {strides = array<i32>} : memref<37x256xf32, #tpu.memory_space<vmem>>, vector<4x256xf32>,
    %c0_70 = arith.constant 0 : index
    %c16_71 = arith.constant 16 : index
    %83 = vector.load %arg10[%c0_70, %c16_71] : memref<4x290xf32, #tpu.memory_space<vmem>>, vector<4x256xf32>
    %84 = vector.broadcast %0 : vector<1x256xf32> to vector<4x256xf32>
    %85 = arith.mulf %83, %84 : vector<4x256xf32>
    %c12 = arith.constant 12 : index
    %c0_72 = arith.constant 0 : index
    %86 = vector.load %arg11[%c12, %c0_72] : memref<37x256xf32, #tpu.memory_space<vmem>>, vector<4x256xf32>
    tpu.vector_store %arg11[%c12, %c0_72], %85 {strides = array<i32>} : memref<37x256xf32, #tpu.memory_space<vmem>>, vector<4x256xf32>,
    %c0_73 = arith.constant 0 : index
    %c17_74 = arith.constant 17 : index
    %87 = vector.load %arg10[%c0_73, %c17_74] : memref<4x290xf32, #tpu.memory_space<vmem>>, vector<4x256xf32>
    %c16_75 = arith.constant 16 : index
    %c0_76 = arith.constant 0 : index
    %88 = vector.load %arg11[%c16_75, %c0_76] : memref<37x256xf32, #tpu.memory_space<vmem>>, vector<4x256xf32>
    tpu.vector_store %arg11[%c16_75, %c0_76], %87 {strides = array<i32>} : memref<37x256xf32, #tpu.memory_space<vmem>>, vector<4x256xf32>,
    %c0_77 = arith.constant 0 : index
    %c18_78 = arith.constant 18 : index
    %89 = vector.load %arg10[%c0_77, %c18_78] : memref<4x290xf32, #tpu.memory_space<vmem>>, vector<4x256xf32>
    %90 = vector.broadcast %1 : vector<1x256xf32> to vector<4x256xf32>
    %91 = arith.mulf %89, %90 : vector<4x256xf32>
    %c20 = arith.constant 20 : index
    %c0_79 = arith.constant 0 : index
    %92 = vector.load %arg11[%c20, %c0_79] : memref<37x256xf32, #tpu.memory_space<vmem>>, vector<4x256xf32>
    tpu.vector_store %arg11[%c20, %c0_79], %91 {strides = array<i32>} : memref<37x256xf32, #tpu.memory_space<vmem>>, vector<4x256xf32>,
    %c0_80 = arith.constant 0 : index
    %c32_81 = arith.constant 32 : index
    %93 = vector.load %arg10[%c0_80, %c32_81] : memref<4x290xf32, #tpu.memory_space<vmem>>, vector<4x256xf32>
    %94 = vector.broadcast %0 : vector<1x256xf32> to vector<4x256xf32>
    %95 = arith.mulf %93, %94 : vector<4x256xf32>
    %c24_82 = arith.constant 24 : index
    %c0_83 = arith.constant 0 : index
    %96 = vector.load %arg11[%c24_82, %c0_83] : memref<37x256xf32, #tpu.memory_space<vmem>>, vector<4x256xf32>
    tpu.vector_store %arg11[%c24_82, %c0_83], %95 {strides = array<i32>} : memref<37x256xf32, #tpu.memory_space<vmem>>, vector<4x256xf32>,
    %c0_84 = arith.constant 0 : index
    %c33_85 = arith.constant 33 : index
    %97 = vector.load %arg10[%c0_84, %c33_85] : memref<4x290xf32, #tpu.memory_space<vmem>>, vector<4x256xf32>
    %c28 = arith.constant 28 : index
    %c0_86 = arith.constant 0 : index
    %98 = vector.load %arg11[%c28, %c0_86] : memref<37x256xf32, #tpu.memory_space<vmem>>, vector<4x256xf32>
    tpu.vector_store %arg11[%c28, %c0_86], %97 {strides = array<i32>} : memref<37x256xf32, #tpu.memory_space<vmem>>, vector<4x256xf32>,
    %c0_87 = arith.constant 0 : index
    %c34_88 = arith.constant 34 : index
    %99 = vector.load %arg10[%c0_87, %c34_88] : memref<4x290xf32, #tpu.memory_space<vmem>>, vector<4x256xf32>
    %100 = vector.broadcast %1 : vector<1x256xf32> to vector<4x256xf32>
    %101 = arith.mulf %99, %100 : vector<4x256xf32>
    %c32_89 = arith.constant 32 : index
    %c0_90 = arith.constant 0 : index
    %102 = vector.load %arg11[%c32_89, %c0_90] : memref<37x256xf32, #tpu.memory_space<vmem>>, vector<4x256xf32>
    tpu.vector_store %arg11[%c32_89, %c0_90], %101 {strides = array<i32>} : memref<37x256xf32, #tpu.memory_space<vmem>>, vector<4x256xf32>,
    %cst_91 = arith.constant 1.000000e+00 : f32
    %103 = vector.broadcast %cst_91 : f32 to vector<1x256xf32>
    %c36 = arith.constant 36 : index
    %c0_92 = arith.constant 0 : index
    %104 = vector.load %arg11[%c36, %c0_92] : memref<37x256xf32, #tpu.memory_space<vmem>>, vector<1x256xf32>
    tpu.vector_store %arg11[%c36, %c0_92], %103 {strides = array<i32>} : memref<37x256xf32, #tpu.memory_space<vmem>>, vector<1x256xf32>,
    %c0_93 = arith.constant 0 : index
    %c0_94 = arith.constant 0 : index
    %105 = vector.load %arg4[%c0_93, %c0_94] : memref<4x37xf32, #tpu.memory_space<vmem>>, vector<4x37xf32>
    %c0_95 = arith.constant 0 : index
    %c0_96 = arith.constant 0 : index
    %106 = vector.load %arg11[%c0_95, %c0_96] : memref<37x256xf32, #tpu.memory_space<vmem>>, vector<37x256xf32>
    %cst_97 = arith.constant dense<0.000000e+00> : vector<4x256xf32>
    %107 = tpu.matmul %105, %106, %cst_97 {dimension_numbers = #tpu.dot_dimension_numbers<[1], [0], [0], [1], [0, 0, 1, 1], [], []>} : vector<4x37xf32>, vector<37x256xf32>, vector<4x256xf32> -> vector<4x256xf32>
    %cst_98 = arith.constant dense<0.000000e+00> : vector<4xf32>
    %108 = vector.multi_reduction <add>, %107, %cst_98 [1] : vector<4x256xf32> to vector<4xf32>
    %109 = vector.shape_cast %108 : vector<4xf32> to vector<4x1xf32>
    %110 = arith.mulf %107, %107 : vector<4x256xf32>
    %cst_99 = arith.constant dense<0.000000e+00> : vector<4xf32>
    %111 = vector.multi_reduction <add>, %110, %cst_99 [1] : vector<4x256xf32> to vector<4xf32>
    %112 = vector.shape_cast %111 : vector<4xf32> to vector<4x1xf32>
    %cst_100 = arith.constant 3.906250e-03 : f32
    %113 = vector.broadcast %cst_100 : f32 to vector<4x1xf32>
    %114 = arith.mulf %109, %113 : vector<4x1xf32>
    %cst_101 = arith.constant 3.906250e-03 : f32
    %115 = vector.broadcast %cst_101 : f32 to vector<4x1xf32>
    %116 = arith.mulf %112, %115 : vector<4x1xf32>
    %117 = arith.mulf %114, %114 : vector<4x1xf32>
    %118 = arith.subf %116, %117 : vector<4x1xf32>
    %119 = vector.broadcast %114 : vector<4x1xf32> to vector<4x256xf32>
    %120 = arith.subf %107, %119 : vector<4x256xf32>
    %cst_102 = arith.constant 9.99999974E-6 : f32
    %121 = vector.broadcast %cst_102 : f32 to vector<4x1xf32>
    %122 = arith.addf %118, %121 : vector<4x1xf32>
    %123 = math.rsqrt %122 : vector<4x1xf32>
    %124 = vector.broadcast %123 : vector<4x1xf32> to vector<4x256xf32>
    %125 = arith.mulf %120, %124 : vector<4x256xf32>
    %cst_103 = arith.constant 0.000000e+00 : f32
    %126 = vector.broadcast %cst_103 : f32 to vector<4x256xf32>
    %127 = arith.cmpf oge, %125, %126 : vector<4x256xf32>
    %cst_104 = arith.constant 0.00999999977 : f32
    %128 = vector.broadcast %cst_104 : f32 to vector<4x256xf32>
    %129 = arith.mulf %128, %125 : vector<4x256xf32>
    %130 = arith.select %127, %125, %129 : vector<4x256xi1>, vector<4x256xf32>
    %c0_105 = arith.constant 0 : index
    %c0_106 = arith.constant 0 : index
    %c0_107 = arith.constant 0 : index
    %131 = vector.load %arg7[%c0_105, %c0_106, %c0_107] : memref<1x4x256xf32, #tpu.memory_space<vmem>>, vector<1x4x256xf32>
    %132 = vector.shape_cast %131 : vector<1x4x256xf32> to vector<4x256xf32>
    %133 = vector.shape_cast %130 : vector<4x256xf32> to vector<1x4x256xf32>
    tpu.vector_store %arg7[%c0_105, %c0_106, %c0_107], %133 {strides = array<i32>} : memref<1x4x256xf32, #tpu.memory_space<vmem>>, vector<1x4x256xf32>,
    return
  }
  func.func @transform_0(%arg0: i32) -> (i32, i32, i32) {
    %c0_i32 = arith.constant 0 : i32
    %c0_i32_0 = arith.constant 0 : i32
    %c0_i32_1 = arith.constant 0 : i32
    return %arg0, %c0_i32, %c0_i32_0 : i32, i32, i32
  }
  func.func @transform_1(%arg0: i32) -> (i32, i32, i32) {
    %c0_i32 = arith.constant 0 : i32
    %c0_i32_0 = arith.constant 0 : i32
    %c0_i32_1 = arith.constant 0 : i32
    return %arg0, %c0_i32, %c0_i32_0 : i32, i32, i32
  }
  func.func @transform_2(%arg0: i32) -> (i32, i32) {
    %c0_i32 = arith.constant 0 : i32
    %c0_i32_0 = arith.constant 0 : i32
    %c0_i32_1 = arith.constant 0 : i32
    return %c0_i32, %c0_i32_0 : i32, i32
  }
  func.func @transform_3(%arg0: i32) -> (i32, i32) {
    %c0_i32 = arith.constant 0 : i32
    %c0_i32_0 = arith.constant 0 : i32
    %c0_i32_1 = arith.constant 0 : i32
    return %c0_i32, %c0_i32_0 : i32, i32
  }
  func.func @transform_4(%arg0: i32) -> (i32, i32) {
    %c0_i32 = arith.constant 0 : i32
    %c0_i32_0 = arith.constant 0 : i32
    %c0_i32_1 = arith.constant 0 : i32
    return %c0_i32, %c0_i32_0 : i32, i32
  }
  func.func @transform_5(%arg0: i32) -> (i32, i32) {
    %c0_i32 = arith.constant 0 : i32
    %c0_i32_0 = arith.constant 0 : i32
    %c0_i32_1 = arith.constant 0 : i32
    return %c0_i32, %c0_i32_0 : i32, i32
  }
  func.func @transform_6(%arg0: i32) -> (i32, i32, i32) {
    %c0_i32 = arith.constant 0 : i32
    %c0_i32_0 = arith.constant 0 : i32
    %c0_i32_1 = arith.constant 0 : i32
    return %arg0, %c0_i32, %c0_i32_0 : i32, i32, i32
  }
}

</mosaic_0001>

<bundles_post_ra>
// kernel: tpu_custom_call.1
= control target key start
LH: loop header
LB: loop body
LE: loop exit
PB: predicated region body
PF: predicated region fallthrough
CT: control target
= control target key end

     0   :  { %11 = vsyncpa [#allocation7], 0  ;;  %s1896_s0 = inlined_call_operand.hbm [shape: f32[2,4,256], index: 0, kind: input, shape index: {}]   ;;  %s1897_s1 = inlined_call_operand.hbm [shape: f32[2,4,256], index: 1, kind: input, shape index: {}]   ;;  %s1898_s2 = inlined_call_operand.vmem [shape: f32[4,73], index: 2, kind: input, shape index: {}]   ;;  %s1899_s3 = inlined_call_operand.vmem [shape: f32[4,37], index: 3, kind: input, shape index: {}]   ;;  %s1900_s4 = inlined_call_operand.vmem [shape: f32[1,256], index: 4, kind: input, shape index: {}]   ;;  %s1901_s5 = inlined_call_operand.vmem [shape: f32[1,256], index: 5, kind: input, shape index: {}]   ;;  %s1902_s6 = inlined_call_operand.hbm [shape: f32[2,4,256], index: 6, kind: output, shape index: {}]  }
   0x1   :  { %13 = vsyncpa [#allocation7 + $0x1], 0 }
   0x2   :  { %14 = vsyncpa [#allocation10], 0 }
   0x3   :  { %16 = vsyncpa [#allocation10 + $0x1], 0 }
   0x4   :  { %17 = vsyncpa [#allocation8], 0 }
   0x5   :  { %19 = vsyncpa [#allocation8 + $0x1], 0  ;;  %s1486_s21 = smov 0   ;;  %s1488_s22 = smov 0  }
   0x6   :  { %s1490_s23 = smov 0   ;;  %s1492_s24 = smov 0  }
   0x7 LB: > { %s1507_s25 = sadd.s32 4294967295, %s1429_s24   ;;  %s1164_s26 = sadd.s32 4294967294, %s1429_s24   ;;  %s1429_s24 = sphi %s1492_s24, %s1950_s24   ;;  %s1425_s23 = sphi %s1490_s23, %s1949_s23   ;;  %s1421_s22 = sphi %s1488_s22, %s1948_s22   ;;  %s1417_s21 = sphi %s1486_s21, %s1947_s21  }
   0x8   : > { %s1511_s27 = sadd.s32 1, %s1429_s24   ;;  %s32_s28 = sadd.s32 1, %s1425_s23 }
   0x9   : > { %s29_s29 = ssub.s32 %s1429_s24, %s1511_s27  ;;  %p39_p0 = scmp.ne.s32.totalorder %s1425_s23, %s1421_s22 }
   0xa   : > { %p30_p1 = scmp.eq.s32.totalorder %s29_s29, 0  ;;  %p40_p2 = scmp.eq.s32.totalorder %s1429_s24, 0 }
   0xb   : > { %p45_p3 = scmp.ne.s32.totalorder %s1421_s22, %s1417_s21  ;;  %p46_p4 = scmp.eq.s32.totalorder %s1507_s25, 0 }
   0xc   : > { %s1523_s30 = scalar_select %p30_p1, %s1425_s23, %s32_s28  }
   0xd   : > { %p1525_p5 = por %p40_p2, %p39_p0  ;;  %p1529_p6 = por %p46_p4, %p45_p3 }
   0xe   : > { %p179_p7 = scmp.eq.s32.totalorder %s1507_s25, 1  ;;  %p185_p8 = scmp.eq.s32.totalorder %s1164_s26, 1 }
   0xf   : > { %s1918_s8 = scalar_select %p1529_p6, 1, 0 }
  0x10   : > { %p1238_p10 = scmp.lt.s32.totalorder %s1429_s24, 2  ;;  %p1536_p11 = por %p179_p7, %p39_p0 }
  0x11   : > { %p1540_p12 = por %p185_p8, %p45_p3  ;;  %s1545_s11 = sand.u32 1, %s1425_s23  }
  0x12   : > { %s1919_s9 = scalar_select %p1536_p11, 1, 0 }
  0x13   : > { %s1920_s10 = scalar_select %p1540_p12, 1, 0 }
  0x14   : > { %s1188_s12 = sshll.u32 %s1429_s24, 7  ;;  %s1167_s13 = sshll.u32 %s1545_s11, 3 }
  0x15   : > { %s1554_s16 = scalar_lea.hbm %s1896_s0, %s1188_s12  ;;  %s221_s17 = scalar_lea.vmem [#allocation6], %s1167_s13 }
  0x16   : > { %s229_s18 = sshll.u32 %s221_s17, 4  ;;  %p1560_p13 = pnand %p1238_p10, %p1525_p5  ;;  %s1564_s18 = int_to_ptr.vmem [resolvable:$true] %s229_s18 }
  0x17   : > { %s218_s20 = scalar_lea.sflag [#allocation7], %s1545_s11  ;;  %s1299_s26 = scalar_lea.hbm %s1554_s16, 128 }
  0x18   : > { %p1300_p2 = scmp.ne.s32.totalorder %s1554_s16, %s1299_s26  ;;  %p1301_p3 = pneg %p1560_p13 }
  0x19   : > { %s1304_s7 = scalar_lea.hbm %s1896_s0, 256  ;;  %p1305_p5 = scmp.lt.u32.totalorder %s1554_s16, %s1896_s0 }
  0x1a   : > { %p1302_p4 = pnand %p1301_p3, %p1300_p2  ;;  %p1306_p8 = scmp.lt.u32.totalorder %s1304_s7, %s1299_s26 }
  0x1b   : > { %p1308_p9 = scmp.lt.u32.totalorder %s1299_s26, %s1554_s16 }
  0x1c   : > { %p1303_p7 = pneg %p1302_p4  ;;  %p1307_p10 = por %p1306_p8, %p1305_p5 }
  0x1e   : > { %p1309_p0 = por %p1308_p9, %p1307_p10 }
  0x20   : > { %p1310_p1 = pnand %p1309_p0, %p1303_p7 }
  0x22   : > { %1313 = shalt.err (!%p1310_p1)
}
  0x23   : > { %s1314_s17 = scalar_lea.vmem %s1564_s18, 128  ;;  %s1431_s28 = smov [#allocation6]  }
  0x24   : > { %p1315_p2 = scmp.ne.s32.totalorder %s1564_s18, %s1314_s17  ;;  %s1319_s29 = sshll.u32 %s1431_s28, 4  ;;  %s1320_s29 = int_to_ptr.vmem [resolvable:$false] %s1319_s29 }
  0x25   : > { %s1321_s14 = scalar_lea.vmem %s1320_s29, 256  ;;  %p1322_p11 = scmp.lt.s32.totalorder %s1564_s18, %s1320_s29 }
  0x26   : > { %p1317_p4 = pnand %p1315_p2, %p1301_p3  ;;  %p1323_p5 = scmp.lt.s32.totalorder %s1321_s14, %s1314_s17 }
  0x28   : > { %p1318_p12 = pneg %p1317_p4  ;;  %p1324_p8 = por %p1323_p5, %p1322_p11 }
  0x2a   : > { %p1325_p9 = pnand %p1324_p8, %p1318_p12 }
  0x2c   : > { %1328 = shalt.err (!%p1325_p9)
}
  0x2d   : > { %1230 = dma.hbm_to_vmem [thread:$0]  (!%p1560_p13), %s1554_s16, 128, %s1564_s18, %s218_s20  }
  0x2e   : > { %p1922_p0 = scmp.lt.s32.totalorder %s1429_s24, 3  ;;  %p1923_p1 = scmp.ge.s32.totalorder %s1429_s24, 1 }
  0x2f   : > { %s1607_s17 = scalar_lea.hbm %s1897_s1, %s1188_s12  ;;  %s240_s28 = scalar_lea.vmem [#allocation9], %s1167_s13 }
  0x30   : > { %p1598_p7 = pnand %p1923_p1, %p1922_p0  ;;  %s248_s29 = sshll.u32 %s240_s28, 4  ;;  %s249_s29 = int_to_ptr.vmem [resolvable:$true] %s248_s29 }
  0x31   : > { %s237_s16 = scalar_lea.sflag [#allocation10], %s1545_s11  ;;  %s1329_s18 = scalar_lea.hbm %s1607_s17, 128 }
  0x32   : > { %s1924_s26 = scalar_select %p1598_p7, 1, 0 }
  0x33   : > { %p1330_p11 = scmp.ne.s32.totalorder %s1607_s17, %s1329_s18  ;;  %s1334_s12 = scalar_lea.hbm %s1897_s1, 256 }
  0x34   : > { %p1335_p2 = scmp.lt.u32.totalorder %s1607_s17, %s1897_s1  ;;  %p1336_p4 = scmp.lt.u32.totalorder %s1334_s12, %s1329_s18 }
  0x35   : > { %p1332_p12 = pnand %p1330_p11, %p1301_p3  ;;  %p1338_p8 = scmp.lt.u32.totalorder %s1329_s18, %s1607_s17 }
  0x36   : > { %p1337_p5 = por %p1336_p4, %p1335_p2 }
  0x37   : > { %p1333_p10 = pneg %p1332_p12 }
  0x38   : > { %p1339_p9 = por %p1338_p8, %p1337_p5 }
  0x3a   : > { %p1340_p0 = pnand %p1339_p9, %p1333_p10 }
  0x3c   : > { %1343 = shalt.err (!%p1340_p0)
}
  0x3d   : > { %s1344_s11 = scalar_lea.vmem %s249_s29, 128  ;;  %s1432_s13 = smov [#allocation9]  }
  0x3e   : > { %p1345_p1 = scmp.ne.s32.totalorder %s249_s29, %s1344_s11  ;;  %s1349_s28 = sshll.u32 %s1432_s13, 4  ;;  %s1350_s28 = int_to_ptr.vmem [resolvable:$false] %s1349_s28 }
  0x3f   : > { %s1351_s20 = scalar_lea.vmem %s1350_s28, 256  ;;  %p1352_p6 = scmp.lt.s32.totalorder %s249_s29, %s1350_s28 }
  0x40   : > { %p1347_p11 = pnand %p1345_p1, %p1301_p3  ;;  %p1353_p7 = scmp.lt.s32.totalorder %s1351_s20, %s1344_s11 }
  0x42   : > { %p1348_p12 = pneg %p1347_p11  ;;  %p1354_p2 = por %p1353_p7, %p1352_p6 }
  0x44   : > { %p1355_p4 = pnand %p1354_p2, %p1348_p12 }
  0x46   : > { %1358 = shalt.err (!%p1355_p4)
}
  0x47   : > { %1233 = dma.hbm_to_vmem [thread:$0]  (!%p1560_p13), %s1607_s17, 128, %s249_s29, %s237_s16  }
  0x48   : > { %p1925_p10 = scmp.ne.s32.totalorder %s1924_s26, 0 }
  0x49   : > { %s1634_s18 = sand.u32 (!%p1925_p10), 1, %s1421_s22   ;;  %p1926_p6 = scmp.ne.s32.totalorder (!%p1925_p10), %s1918_s8, 0 }
  0x4a   : > { %257 = sbr.rel (%p1925_p10) target bundleno = 1461 (0x5b5), region = 44  ;;  %s1637_s14 = sshll.u32 (!%p1925_p10), %s1634_s18, 3 }
  0x4b   : > { %s260_s12 = scalar_lea.sflag (!%p1925_p10), [#allocation7], %s1634_s18  ;;  %s263_s7 = scalar_lea.vmem (!%p1925_p10), [#allocation6], %s1637_s14 }
  0x51   : > { %1404 = dma.done.wait (%p1926_p6), %s260_s12, 128  }
  0x52   : > { %1406 = vsyncadd (%p1926_p6), %s260_s12, 4294967168  ;;  %s269_s19 = scalar_lea.sflag [#allocation10], %s1634_s18  ;;  %s272_s26 = scalar_lea.vmem [#allocation9], %s1637_s14 }
  0x53   : > { %1408 = dma.done.wait (%p1926_p6), %s269_s19, 128  }
  0x54   : > { %1410 = vsyncadd (%p1926_p6), %s269_s19, 4294967168  ;;  %v347_v0 = vlaneseq  ;;  %v1433_v1 = vmov 0.0   ;;  %v1434_v2 = vmov 1.0   ;;  %v308_v4 = vld [vmem:[%s263_s7] sm:$0xff]  ;;  %v325_v5 = vld [vmem:[%s272_s26] sm:$0xff]  ;;  %s1435_s17 = smov 17  }
  0x55   : > { %685 = vmatprep.mubr.f32.mxu0 %v1433_v1  ;;  %1016 = vmatprep.mubr.f32.mxu1 %v1433_v1  ;;  %v310_v6 = vcombine.high %v308_v4, %v308_v4  ;;  %v327_v7 = vcombine.low %v325_v5, %v325_v5  ;;  %v307_v9 = vld [vmem:[%s1901_s5] sm:$0x3]  ;;  %s1436_s11 = smov 2   ;;  %s1437_s13 = smov 16   ;;  %vm320_vm1 = vcmask 1043592   ;;  %vm336_vm2 = vcmask 1047692  }
  0x56   : > { %vm584_vm0 = vcmp.lt.s32.totalorder %v347_v0, 256  ;;  %v348_v3 = vshrl.u32 %v347_v0, 7  ;;  %311 = vrot.lane.b32.xlu0 %v308_v4, %s1435_s17  ;;  %v306_v12 = vld [vmem:[%s1900_s4] sm:$0x3]  ;;  %s1438_s28 = smov 18   ;;  %s1439_s20 = smov 32  }
  0x57   : > { %587 = vst.msk [vmem:[#allocation3 + $0x90] ss:$8 sm:$0x3] %vm584_vm0, %v1434_v2  ;;  %928 = vst.msk [vmem:[#allocation5 + $0x44] ss:$8 sm:$0x3] %vm584_vm0, %v1434_v2  ;;  %328 = vrot.lane.b32.xlu1 %v327_v7, %s1435_s17 }
  0x58   : > { %v349_v8 = vsub.s32 0, %v348_v3  ;;  %v353_v10 = vsub.s32 1, %v348_v3  ;;  %s1440_s12 = smov 34   ;;  %vm315_vm3 = vcmask 138240   ;;  %vm323_vm4 = vcmask 134144   ;;  %s1441_s7 = smov 127  }
  0x59   : > { %vm339_vm5 = vcmask 138244   ;;  %vm342_vm6 = vcmask 277640   ;;  %s1442_s19 = smov 111   ;;  %vm396_vm7 = vcmask 15360   ;;  %vm427_vm8 = vcmask 130048   ;;  %s1443_s26 = smov 95  }
  0x5a   : > { %313 = vrot.lane.b32.xlu0 %v310_v6, %s1435_s17  ;;  %v1659_v11 = vrot.slane %v307_v9, %v349_v8  ;;  %v1665_v13 = vrot.slane %v307_v9, %v353_v10  ;;  %v1669_v14 = vrot.slane %v306_v12, %v349_v8  ;;  %v1673_v15 = vrot.slane %v306_v12, %v353_v10  ;;  %s1444_s8 = smov 126   ;;  %s1905_s29 = smov 112  }
  0x5b   : > { %330 = vrot.lane.b32.xlu1 %v325_v5, %s1435_s17  ;;  %vm477_vm9 = vcmask 146432   ;;  %vm508_vm10 = vcmask 261120   ;;  %s1912_s16 = smov 110   ;;  %vm558_vm11 = vcmask 277504   ;;  %s1447_s15 = smov 96   ;;  %vm373_vm12 = vcmask 1039360  }
  0x5c   : > { %vm1915_vm13 = vcmask 908288   ;;  %vm544_vm14 = vcmask 777216   ;;  %vm1908_vm15 = vcmask 1031168   ;;  %vm1907_vm0 = vcmask 916480   ;;  %p1944_p3 = scmp.ne.s32.totalorder %s1919_s9, 0 }
  0x5e   : > { %392 = vrot.lane.b32.xlu0 %v1659_v11, %s1436_s11 }
  0x5f   : > { %394 = vrot.lane.b32.xlu1 %v1665_v13, %s1436_s11 }
  0x62   : > { %423 = vrot.lane.b32.xlu0 %v1669_v14, %s1437_s13 }
  0x63   : > { %425 = vrot.lane.b32.xlu1 %v1673_v15, %s1437_s13 }
  0x66   : > { %473 = vrot.lane.b32.xlu0 %v1659_v11, %s1438_s28 }
  0x67   : > { %475 = vrot.lane.b32.xlu1 %v1665_v13, %s1438_s28 }
  0x6a   : > { %504 = vrot.lane.b32.xlu0 %v1669_v14, %s1439_s20 }
  0x6b   : > { %506 = vrot.lane.b32.xlu1 %v1673_v15, %s1439_s20 }
  0x6e   : > { %554 = vrot.lane.b32.xlu0 %v1659_v11, %s1440_s12 }
  0x6f   : > { %556 = vrot.lane.b32.xlu1 %v1665_v13, %s1440_s12 }
  0xc8   : > { %v312_v16 = vpop.permute.xlu0 %311 }
  0xc9   : > { %321 = vst.msk [vmem:[#allocation2] sm:$0xf] %vm320_vm1, %v312_v16  ;;  %v329_v17 = vpop.permute.xlu1 %328 }
  0xca   : > { %337 = vst.msk [vmem:[#allocation2] sm:$0xf0] %vm336_vm2, %v329_v17  ;;  %vm1909_vm2 = vcmask 900096  }
  0xcb   : > { %341 = vst.msk [vmem:[#allocation2] sm:$0xff] %vm315_vm3, %v1433_v1 }
  0xcc   : > { %v314_v18 = vpop.permute.xlu0 %313 }
  0xcd   : > { %v316_v19 = vsel %vm315_vm3, %v312_v16, %v314_v18  ;;  %324 = vst.msk [vmem:[#allocation2 + $0x10] sm:$0xf] %vm323_vm4, %v314_v18  ;;  %v331_v20 = vpop.permute.xlu1 %330 }
  0xce   : > { %322 = vst [vmem:[#allocation2 + $0x8] sm:$0xf] %v316_v19  ;;  %v332_v21 = vsel %vm315_vm3, %v329_v17, %v331_v20  ;;  %340 = vst.msk [vmem:[#allocation2 + $0x10] sm:$0xf0] %vm339_vm5, %v331_v20  ;;  %vm1914_vm5 = vcmask 785408  }
  0xcf   : > { %338 = vst [vmem:[#allocation2 + $0x8] sm:$0xf0] %v332_v21  ;;  %343 = vst.msk [vmem:[#allocation2 + $0x10] sm:$0xff] %vm342_vm6, %v1433_v1  ;;  %vm575_vm6 = vcmask 769024  }
  0xd0   : > { %v393_v28 = vpop.permute.xlu0 %392 }
  0xd1   : > { %v395_v27 = vpop.permute.xlu1 %394 }
  0xd2   : > { %v1698_v22 = vld [vmem:[#allocation2] sm:$0xff]  ;;  %v397_v29 = vsel %vm396_vm7, %v393_v28, %v395_v27 }
  0xd3   : > { %v1702_v23 = vmul.f32 %v1698_v22, %v1669_v14  ;;  %v401_v38 = vmul.f32 %v393_v28, %v1698_v22 }
  0xd4   : > { %v424_v31 = vpop.permute.xlu0 %423 }
  0xd5   : > { %v426_v30 = vpop.permute.xlu1 %425  ;;  %v432_v44 = vmul.f32 %v424_v31, %v1698_v22 }
  0xd6   : > { %v345_v24 = vld [vmem:[#allocation2 + $0x8] sm:$0xff]  ;;  %v1704_v25 = vld [vmem:[#allocation2 + $0x10] sm:$0xff]  ;;  %v428_v33 = vsel %vm427_vm8, %v424_v31, %v426_v30 }
  0xd7   : > { %371 = vrot.lane.b32.xlu1 %v1704_v25, %s1441_s7  ;;  %369 = vrot.lane.b32.xlu0 %v345_v24, %s1441_s7  ;;  %v1710_v26 = vmul.f32 %v1673_v15, %v345_v24  ;;  %v402_v32 = vmul.f32 %v397_v29, %v345_v24  ;;  %v433_v34 = vmul.f32 %v428_v33, %v345_v24 }
  0xd8   : > { %v474_v36 = vpop.permute.xlu0 %473  ;;  %v403_v37 = vmul.f32 %v395_v27, %v1704_v25  ;;  %v434_v39 = vmul.f32 %v426_v30, %v1704_v25 }
  0xd9   : > { %v476_v35 = vpop.permute.xlu1 %475  ;;  %v482_v51 = vmul.f32 %v474_v36, %v1698_v22 }
  0xda   : > { %v478_v40 = vsel %vm477_vm9, %v474_v36, %v476_v35  ;;  %v484_v47 = vmul.f32 %v476_v35, %v1704_v25 }
  0xdb   : > { %459 = vrot.lane.b32.xlu1 %v345_v24, %s1442_s19  ;;  %367 = vrot.lane.b32.xlu0 %v1698_v22, %s1441_s7  ;;  %v483_v43 = vmul.f32 %v478_v40, %v345_v24 }
  0xdc   : > { %v505_v42 = vpop.permute.xlu0 %504 }
  0xdd   : > { %v507_v41 = vpop.permute.xlu1 %506  ;;  %v513_v50 = vmul.f32 %v505_v42, %v1698_v22 }
  0xde   : > { %v509_v45 = vsel %vm508_vm10, %v505_v42, %v507_v41  ;;  %v515_v54 = vmul.f32 %v507_v41, %v1704_v25  ;;  %v608_v41 = vld [vmem:[#allocation3 + $0x90] sm:$0x1] }
  0xdf   : > { %457 = vrot.lane.b32.xlu1 %v1698_v22, %s1442_s19  ;;  %461 = vrot.lane.b32.xlu0 %v1704_v25, %s1442_s19  ;;  %v514_v46 = vmul.f32 %v509_v45, %v345_v24 }
  0xe0   : > { %v555_v49 = vpop.permute.xlu0 %554 }
  0xe1   : > { %v557_v48 = vpop.permute.xlu1 %556  ;;  %v563_v55 = vmul.f32 %v555_v49, %v1698_v22 }
  0xe2   : > { %v559_v52 = vsel %vm558_vm11, %v555_v49, %v557_v48  ;;  %v565_v56 = vmul.f32 %v557_v48, %v1704_v25 }
  0xe3   : > { %540 = vrot.lane.b32.xlu1 %v345_v24, %s1443_s26  ;;  %542 = vrot.lane.b32.xlu0 %v1704_v25, %s1443_s26  ;;  %v564_v53 = vmul.f32 %v559_v52, %v345_v24 }
  0xe7   : > { %409 = vrot.lane.b32.xlu1 %v402_v32, %s1444_s8  ;;  %538 = vrot.lane.b32.xlu0 %v1698_v22, %s1443_s26 }
  0xeb   : > { %440 = vrot.lane.b32.xlu1 %v433_v34, %s1905_s29  ;;  %411 = vrot.lane.b32.xlu0 %v403_v37, %s1444_s8 }
  0xef   : > { %407 = vrot.lane.b32.xlu1 %v401_v38, %s1444_s8  ;;  %442 = vrot.lane.b32.xlu0 %v434_v39, %s1905_s29 }
  0xf3   : > { %490 = vrot.lane.b32.xlu1 %v483_v43, %s1912_s16  ;;  %438 = vrot.lane.b32.xlu0 %v432_v44, %s1905_s29  ;;  %s1910_s29 = smov 94   ;;  %v609_v44 = vld [vmem:[#allocation3 + $0x98] sm:$0x1] }
  0xf7   : > { %521 = vrot.lane.b32.xlu1 %v514_v46, %s1447_s15  ;;  %492 = vrot.lane.b32.xlu0 %v484_v47, %s1912_s16 }
  0xfb   : > { %519 = vrot.lane.b32.xlu1 %v513_v50, %s1447_s15  ;;  %488 = vrot.lane.b32.xlu0 %v482_v51, %s1912_s16  ;;  %v589_v50 = vld [vmem:[%s1898_s2] sm:$0xf]  ;;  %s1450_s16 = smov [#allocation11]  }
  0xff   : > { %571 = vrot.lane.b32.xlu1 %v564_v53, %s1910_s29  ;;  %523 = vrot.lane.b32.xlu0 %v515_v54, %s1447_s15 }
 0x103   : > { %569 = vrot.lane.b32.xlu1 %v563_v55, %s1910_s29  ;;  %573 = vrot.lane.b32.xlu0 %v565_v56, %s1910_s29 }
 0x149   : > { %v372_v57 = vpop.permute.xlu1 %371  ;;  %v370_v58 = vpop.permute.xlu0 %369 }
 0x14a   : > { %v375_v59 = vsel %vm373_vm12, %v370_v58, %v372_v57 }
 0x14b   : > { %v1191_v60 = vpack.c.bf16 %v375_v59, %v1710_v26 }
 0x14d   : > { %v460_v61 = vpop.permute.xlu1 %459  ;;  %v368_v62 = vpop.permute.xlu0 %367  ;;  %1192 = vmatprep.subr.bf16.mxu0 %v1191_v60 }
 0x14e   : > { %v374_v63 = vsel %vm373_vm12, %v368_v62, %v370_v58  ;;  %v738_v62 = vcombine.low %v1669_v14, %v1673_v15 }
 0x14f   : > { %v1193_v0 = vpack.c.bf16 %v374_v63, %v1702_v23 }
 0x151   : > { %v458_v2 = vpop.permute.xlu1 %457  ;;  %v462_v4 = vpop.permute.xlu0 %461  ;;  %1194 = vmatpush1.bf16.msra.mxu0 %v1193_v0 }
 0x152   : > { %v464_v3 = vsel %vm1915_vm13, %v458_v2, %v460_v61  ;;  %v465_v5 = vsel %vm1915_vm13, %v460_v61, %v462_v4  ;;  %vm1916_vm13 = vcmask 1043456   ;;  %v766_v61 = vcombine.low %v1659_v11, %v1665_v13 }
 0x155   : > { %v541_v6 = vpop.permute.xlu1 %540  ;;  %v543_v7 = vpop.permute.xlu0 %542 }
 0x156   : > { %v546_v8 = vsel %vm544_vm14, %v541_v6, %v543_v7 }
 0x159   : > { %v410_v9 = vpop.permute.xlu1 %409  ;;  %v539_v10 = vpop.permute.xlu0 %538 }
 0x15a   : > { %v545_v12 = vsel %vm544_vm14, %v539_v10, %v541_v6 }
 0x15d   : > { %v441_v16 = vpop.permute.xlu1 %440  ;;  %v412_v17 = vpop.permute.xlu0 %411 }
 0x15e   : > { %v415_v18 = vsel %vm1908_vm15, %v410_v9, %v412_v17 }
 0x161   : > { %v408_v19 = vpop.permute.xlu1 %407  ;;  %v443_v21 = vpop.permute.xlu0 %442 }
 0x162   : > { %v414_v20 = vsel %vm1908_vm15, %v408_v19, %v410_v9  ;;  %v446_v22 = vsel %vm1907_vm0, %v441_v16, %v443_v21  ;;  %vm1449_vm15 = vmmov 1  }
 0x163   : > { %v1195_v23 = vpack.c.bf16 %v446_v22, %v415_v18 }
 0x165   : > { %v491_v24 = vpop.permute.xlu1 %490  ;;  %v439_v25 = vpop.permute.xlu0 %438  ;;  %1196 = vmatprep.subr.bf16.mxu0 %v1195_v23 }
 0x166   : > { %v445_v26 = vsel %vm1907_vm0, %v439_v25, %v441_v16  ;;  %vm614_vm0 = vcmask 1040384  }
 0x167   : > { %v1197_v27 = vpack.c.bf16 %v445_v26, %v414_v20 }
 0x169   : > { %v522_v28 = vpop.permute.xlu1 %521  ;;  %v493_v29 = vpop.permute.xlu0 %492  ;;  %1198 = vmatpush1.bf16.msra.mxu0 %v1197_v27 }
 0x16a   : > { %v496_v30 = vsel %vm1909_vm2, %v491_v24, %v493_v29 }
 0x16b   : > { %v1199_v31 = vpack.c.bf16 %v496_v30, %v465_v5 }
 0x16d   : > { %v520_v32 = vpop.permute.xlu1 %519  ;;  %v489_v34 = vpop.permute.xlu0 %488  ;;  %1200 = vmatprep.subr.bf16.mxu0 %v1199_v31 }
 0x16e   : > { %v526_v33 = vsel %vm1914_vm5, %v520_v32, %v522_v28  ;;  %v495_v35 = vsel %vm1909_vm2, %v489_v34, %v491_v24  ;;  %vm1208_vm2 = vmpackc.low %vm614_vm0, %vm1449_vm15 }
 0x16f   : > { %v1201_v36 = vpack.c.bf16 %v495_v35, %v464_v3  ;;  %v1205_v43 = vpack.c.bf16 %v545_v12, %v526_v33 }
 0x171   : > { %v572_v37 = vpop.permute.xlu1 %571  ;;  %v524_v38 = vpop.permute.xlu0 %523  ;;  %1202 = vmatpush1.bf16.msra.mxu0 %v1201_v36 }
 0x172   : > { %v527_v39 = vsel %vm1914_vm5, %v522_v28, %v524_v38  ;;  %vm610_vm5 = vcmask 596992  }
 0x173   : > { %v1203_v40 = vpack.c.bf16 %v546_v8, %v527_v39 }
 0x175   : > { %v570_v42 = vpop.permute.xlu1 %569  ;;  %v574_v46 = vpop.permute.xlu0 %573  ;;  %1204 = vmatprep.subr.bf16.mxu0 %v1203_v40 }
 0x176   : > { %v576_v45 = vsel %vm575_vm6, %v570_v42, %v572_v37  ;;  %v577_v47 = vsel %vm575_vm6, %v572_v37, %v574_v46  ;;  %1206 = vmatpush1.bf16.msra.mxu0 %v1205_v43 }
 0x177   : > { %v1210_v48 = vpack.c.bf16 %v608_v41, %v576_v45  ;;  %v1207_v49 = vpack.c.bf16 %v609_v44, %v577_v47 }
 0x179   : > { %1209 = vmatprep.subr.msk.bf16.mxu0 %vm1208_vm2, %v1207_v49 }
 0x17a   : > { %1212 = vmatpush1.bf16.msk.msra.mxu0 %vm1208_vm2, %v1210_v48  ;;  %vm730_vm2 = vcmask 1047556  }
 0x17d   : > { %1179 = vmatmul.mubr.msk.f32.vlgmr.msra.gmra.mrb[0].mxu0 %vm610_vm5, %v589_v50  ;;  %vm731_vm5 = vmor %vm730_vm2, %vm320_vm1  ;;  %vm1930_vm1 = vcmask 908288  }
 0x250   : > { %v687_v51 = vpop.f32.mrb[0].mxu0 }
 0x251   : > { %v698_v52 = vmul.f32 %v687_v51, %v687_v51  ;;  %v689_v53 = vpop.f32.mrb[1].mxu0  ;;  %v693_v54 = vsel %vm1916_vm13, %v687_v51, 0.0 }
 0x252   : > { %v694_v55 = vsel %vm1916_vm13, %v689_v53, 0.0  ;;  %v699_v56 = vmul.f32 %v689_v53, %v689_v53 }
 0x253   : > { %v695_v57 = vadd.f32 %v694_v55, %v693_v54  ;;  %v700_v58 = vsel %vm1916_vm13, %v698_v52, 0.0 }
 0x254   : > { %v701_v59 = vsel %vm1916_vm13, %v699_v56, 0.0  ;;  %vm735_vm13 = vcmask 273544  }
 0x255   : > { %696 = vadd.xlane.f32.xlu0 %v695_v57  ;;  %v702_v60 = vadd.f32 %v701_v59, %v700_v58 }
 0x257   : > { %703 = vadd.xlane.f32.xlu1 %v702_v60 }
 0x268   : > { %767 = vrot.lane.b32.xlu1 %v766_v61, %s1436_s11  ;;  %s1928_s11 = smov 110  }
 0x26c   : > { %861 = vrot.lane.b32.xlu1 %v738_v62, %s1439_s20 }
 0x270   : > { %904 = vrot.lane.b32.xlu1 %v766_v61, %s1440_s12  ;;  %s1190_s12 = sshll.u32 %s1507_s25, 7  ;;  %s1057_s25 = scalar_lea.sflag [#allocation8], %s1634_s18 }
 0x271   : > { %s1852_s29 = scalar_lea.hbm %s1902_s6, %s1190_s12 }
 0x2e2   : > { %v697_v63 = vpop.xlane.xlu0 %696 }
 0x2e3   : > { %v705_v0 = vmul.f32 0.00390625, %v697_v63 }
 0x2e4   : > { %v704_v2 = vpop.xlane.xlu1 %703 }
 0x2e5   : > { %v706_v3 = vmul.f32 0.00390625, %v704_v2  ;;  %v707_v4 = vmul.f32 %v705_v0, %v705_v0  ;;  %v709_v7 = vsub.f32 %v687_v51, %v705_v0  ;;  %v710_v8 = vsub.f32 %v689_v53, %v705_v0 }
 0x2e7   : > { %v708_v5 = vsub.f32 %v706_v3, %v707_v4 }
 0x2e8   : > { %v768_v20 = vpop.permute.xlu1 %767 }
 0x2e9   : > { %v711_v6 = vadd.f32 1e-05, %v708_v5  ;;  %v769_v31 = vrot.slane %v768_v20, 4 }
 0x2eb   : > { %1295 = vrsqrt.f32 %v711_v6  ;;  %v770_v35 = vsel %vm396_vm7, %v769_v31, %v768_v20  ;;  %vm1933_vm7 = vcmask 1031168  }
 0x2ec   : > { %v862_v23 = vpop.permute.xlu1 %861 }
 0x2ed   : > { %v863_v25 = vrot.slane %v862_v23, 4 }
 0x2ef   : > { %v864_v48 = vsel %vm508_vm10, %v863_v25, %v862_v23 }
 0x2f0   : > { %v905_v50 = vpop.permute.xlu1 %904 }
 0x2f1   : > { %v906_v53 = vrot.slane %v905_v50, 4 }
 0x2f3   : > { %v907_v56 = vsel %vm558_vm11, %v906_v53, %v905_v50  ;;  %vm1937_vm11 = vcmask 785408  }
 0x2f5   : > { %v1296_v11 = vpop.eup %1295 }
 0x2f6   : > { %v713_v13 = vmul.f32 %v1296_v11, %v709_v7  ;;  %v714_v9 = vmul.f32 %v1296_v11, %v710_v8 }
 0x2f8   : > { %vm715_vm15 = vcmp.ge.f32.partialorder %v713_v13, 0.0  ;;  %vm716_vm0 = vcmp.ge.f32.partialorder %v714_v9, 0.0  ;;  %v717_v14 = vmul.f32 0.01, %v713_v13  ;;  %v718_v15 = vmul.f32 0.01, %v714_v9 }
 0x2fa   : > { %v719_v10 = vsel %vm715_vm15, %v713_v13, %v717_v14  ;;  %v720_v12 = vsel %vm716_vm0, %v714_v9, %v718_v15  ;;  %vm941_vm15 = vcmask 302080  }
 0x2fb   : > { %v723_v16 = vcombine.low %v719_v10, %v720_v12 }
 0x2fd   : > { %724 = vrot.lane.b32.xlu0 %v723_v16, %s1435_s17  ;;  %s1927_s17 = smov 112  }
 0x301   : > { %792 = vrot.lane.b32.xlu0 %v738_v62, %s1437_s13  ;;  %s1929_s13 = smov 94  }
 0x305   : > { %835 = vrot.lane.b32.xlu0 %v766_v61, %s1438_s28 }
 0x36f   : > { %v725_v17 = vpop.permute.xlu0 %724 }
 0x370   : > { %v726_v18 = vrot.slane %v725_v17, 4 }
 0x372   : > { %v727_v19 = vsel %vm315_vm3, %v726_v18, %v725_v17  ;;  %733 = vst.msk [vmem:[#allocation4 + $0x8] sm:$0xf] %vm323_vm4, %v726_v18  ;;  %vm1931_vm3 = vmmov %vm1930_vm1 }
 0x373   : > { %732 = vst.msk [vmem:[#allocation4] sm:$0xff] %vm731_vm5, %v727_v19  ;;  %v793_v29 = vpop.permute.xlu0 %792 }
 0x374   : > { %736 = vst.msk [vmem:[#allocation4 + $0x8] sm:$0xf] %vm735_vm13, %v1433_v1  ;;  %v794_v32 = vrot.slane %v793_v29, 4 }
 0x375   : > { %734 = vst.msk [vmem:[#allocation4] sm:$0xf] %vm323_vm4, %v1433_v1  ;;  %vm1932_vm4 = vcmask 900096  }
 0x376   : > { %v795_v36 = vsel %vm427_vm8, %v794_v32, %v793_v29  ;;  %vm1934_vm8 = vmmov %vm1933_vm7 }
 0x377   : > { %v836_v37 = vpop.permute.xlu0 %835  ;;  %vm1939_vm13 = vmmov %vm1932_vm4 }
 0x378   : > { %v837_v41 = vrot.slane %v836_v37, 4 }
 0x37a   : > { %v838_v44 = vsel %vm477_vm9, %v837_v41, %v836_v37  ;;  %vm1935_vm9 = vcmask 916480  }
 0x37b   : > { %v817_v22 = vld [vmem:[#allocation4 + $0x8] sm:$0xf]  ;;  %vm1936_vm10 = vmmov %vm1935_vm9 }
 0x37c   : > { %v737_v21 = vld [vmem:[#allocation4] sm:$0xff]  ;;  %825 = vrot.lane.b32.xlu0 %v817_v22, %s1442_s19  ;;  %v860_v24 = vld [vmem:[#allocation4 + $0x8] sm:$0xf] }
 0x37d   : > { %892 = vrot.lane.b32.xlu1 %v737_v21, %s1443_s26  ;;  %v1293_v26 = vld [vmem:[#allocation4 + $0x8] ss:$0 sps:$4 sm:$0xff]   ;;  %v740_v27 = vmul.f32 %v738_v62, %v737_v21  ;;  %v868_v28 = vmul.f32 %v863_v25, %v860_v24  ;;  %v773_v38 = vmul.f32 %v770_v35, %v737_v21  ;;  %v798_v40 = vmul.f32 %v795_v36, %v737_v21 }
 0x37e   : > { %v765_v1 = vld [vmem:[#allocation4 + $0x8] sm:$0xf]  ;;  %v820_v43 = vcombine.high %v737_v21, %v737_v21  ;;  %v888_v45 = vcombine.low %v737_v21, %v737_v21  ;;  %v841_v47 = vmul.f32 %v838_v44, %v737_v21  ;;  %v867_v51 = vmul.f32 %v864_v48, %v737_v21 }
 0x37f   : > { %v742_v30 = vcombine.high %v740_v27, %v740_v27  ;;  %744 = vst [vmem:[#allocation5] sm:$0xf] %v740_v27  ;;  %v1294_v33 = vld [vmem:[#allocation4 + $0x8] ss:$0 sps:$4 sm:$0xff]   ;;  %v774_v34 = vmul.f32 %v769_v31, %v765_v1  ;;  %v777_v54 = vcombine.high %v773_v38, %v773_v38  ;;  %v802_v57 = vcombine.low %v798_v40, %v798_v40 }
 0x380   : > { %754 = vrot.lane.b32.xlu0 %v737_v21, %s1441_s7  ;;  %v834_v39 = vld [vmem:[#allocation4 + $0x8] sm:$0xf]  ;;  %v910_v58 = vmul.f32 %v907_v56, %v737_v21  ;;  %v871_v59 = vcombine.high %v867_v51, %v867_v51  ;;  %v845_v60 = vcombine.low %v841_v47, %v841_v47 }
 0x381   : > { %821 = vrot.lane.b32.xlu1 %v737_v21, %s1442_s19  ;;  %745 = vst [vmem:[#allocation5 + $0x8] sm:$0xf] %v742_v30  ;;  %v842_v42 = vmul.f32 %v837_v41, %v834_v39  ;;  %v791_v49 = vld [vmem:[#allocation4 + $0x8] sm:$0xf] }
 0x382   : > { %v799_v52 = vmul.f32 %v794_v32, %v791_v49  ;;  %v914_v61 = vcombine.high %v910_v58, %v910_v58  ;;  %v903_v62 = vld [vmem:[#allocation4 + $0x8] sm:$0xf] }
 0x383   : > { %v846_v46 = vcombine.low %v842_v42, %v842_v42  ;;  %v911_v63 = vmul.f32 %v906_v53, %v903_v62 }
 0x384   : > { %876 = vrot.lane.b32.xlu0 %v868_v28, %s1447_s15  ;;  %v803_v55 = vcombine.low %v799_v52, %v799_v52 }
 0x385   : > { %756 = vrot.lane.b32.xlu1 %v1293_v26, %s1441_s7 }
 0x388   : > { %894 = vrot.lane.b32.xlu0 %v1294_v33, %s1443_s26 }
 0x389   : > { %782 = vrot.lane.b32.xlu1 %v774_v34, %s1444_s8 }
 0x38c   : > { %806 = vrot.lane.b32.xlu0 %v798_v40, %s1927_s17 }
 0x38d   : > { %778 = vrot.lane.b32.xlu1 %v773_v38, %s1444_s8 }
 0x390   : > { %752 = vrot.lane.b32.xlu0 %v888_v45, %s1441_s7  ;;  %s305_s7 = scalar_lea.vmem [#allocation11], %s1637_s14 }
 0x391   : > { %823 = vrot.lane.b32.xlu1 %v820_v43, %s1442_s19  ;;  %s1071_s19 = sshll.u32 %s305_s7, 4  ;;  %s1854_s19 = int_to_ptr.vmem [resolvable:$true] %s1071_s19 }
 0x392   : > { %s1359_s14 = scalar_lea.vmem %s1854_s19, 128 }
 0x393   : > { %p1360_p13 = scmp.ne.s32.totalorder %s1854_s19, %s1359_s14 }
 0x394   : > { %851 = vrot.lane.b32.xlu0 %v846_v46, %s1928_s11 }
 0x395   : > { %849 = vrot.lane.b32.xlu1 %v841_v47, %s1928_s11  ;;  %p1361_p7 = pnand %p1360_p13, %p1944_p3 }
 0x397   : > { %p1362_p5 = pneg %p1361_p7 }
 0x398   : > { %780 = vrot.lane.b32.xlu0 %v777_v54, %s1444_s8  ;;  %v930_v54 = vld [vmem:[%s1899_s3] sm:$0xf] }
 0x399   : > { %872 = vrot.lane.b32.xlu1 %v867_v51, %s1447_s15 }
 0x39c   : > { %804 = vrot.lane.b32.xlu0 %v802_v57, %s1927_s17 }
 0x39d   : > { %808 = vrot.lane.b32.xlu1 %v803_v55, %s1927_s17 }
 0x3a0   : > { %847 = vrot.lane.b32.xlu0 %v845_v60, %s1928_s11 }
 0x3a1   : > { %874 = vrot.lane.b32.xlu1 %v871_v59, %s1447_s15  ;;  %s1363_s15 = sshll.u32 %s1450_s16, 4  ;;  %s1364_s15 = int_to_ptr.vmem [resolvable:$false] %s1363_s15 }
 0x3a2   : > { %s1365_s17 = scalar_lea.vmem %s1364_s15, 256  ;;  %p1366_p8 = scmp.lt.s32.totalorder %s1854_s19, %s1364_s15 }
 0x3a3   : > { %p1367_p9 = scmp.lt.s32.totalorder %s1365_s17, %s1359_s14 }
 0x3a4   : > { %890 = vrot.lane.b32.xlu0 %v888_v45, %s1443_s26 }
 0x3a5   : > { %917 = vrot.lane.b32.xlu1 %v914_v61, %s1929_s13  ;;  %p1368_p0 = por %p1367_p9, %p1366_p8 }
 0x3a7   : > { %p1369_p1 = pnand %p1368_p0, %p1362_p5 }
 0x3a8   : > { %919 = vrot.lane.b32.xlu0 %v911_v63, %s1929_s13 }
 0x3a9   : > { %915 = vrot.lane.b32.xlu1 %v910_v58, %s1929_s13 }
 0x3ee   : > { %v826_v2 = vpop.permute.xlu0 %825 }
 0x3ef   : > { %v893_v0 = vpop.permute.xlu1 %892 }
 0x3f2   : > { %v755_v4 = vpop.permute.xlu0 %754 }
 0x3f3   : > { %v822_v3 = vpop.permute.xlu1 %821 }
 0x3f6   : > { %v877_v6 = vpop.permute.xlu0 %876 }
 0x3f7   : > { %v757_v5 = vpop.permute.xlu1 %756 }
 0x3f8   : > { %v759_v7 = vsel %vm373_vm12, %v755_v4, %v757_v5 }
 0x3f9   : > { %763 = vst [vmem:[#allocation5 + $0x8] sm:$0xf0] %v759_v7 }
 0x3fa   : > { %v895_v11 = vpop.permute.xlu0 %894 }
 0x3fb   : > { %v783_v8 = vpop.permute.xlu1 %782  ;;  %v897_v13 = vsel %vm544_vm14, %v893_v0, %v895_v11 }
 0x3fc   : > { %901 = vst [vmem:[#allocation5 + $0x38] sm:$0xf0] %v897_v13 }
 0x3fe   : > { %v807_v14 = vpop.permute.xlu0 %806 }
 0x3ff   : > { %v779_v9 = vpop.permute.xlu1 %778 }
 0x400   : > { %v932_v35 = vld [vmem:[#allocation5 + $0x8] sm:$0xff] }
 0x402   : > { %v753_v10 = vpop.permute.xlu0 %752 }
 0x403   : > { %v824_v15 = vpop.permute.xlu1 %823  ;;  %v758_v17 = vsel %vm373_vm12, %v753_v10, %v755_v4  ;;  %vm1938_vm12 = vmmov %vm1937_vm11 }
 0x404   : > { %v827_v12 = vsel %vm1930_vm1, %v822_v3, %v824_v15  ;;  %v828_v16 = vsel %vm1931_vm3, %v824_v15, %v826_v2  ;;  %762 = vst [vmem:[#allocation5] sm:$0xf0] %v758_v17 }
 0x405   : > { %831 = vst [vmem:[#allocation5 + $0x20] sm:$0xf] %v827_v12  ;;  %832 = vst [vmem:[#allocation5 + $0x28] sm:$0xf] %v828_v16 }
 0x406   : > { %v852_v19 = vpop.permute.xlu0 %851 }
 0x407   : > { %v850_v18 = vpop.permute.xlu1 %849 }
 0x408   : > { %v854_v20 = vsel %vm1932_vm4, %v850_v18, %v852_v19 }
 0x409   : > { %858 = vst [vmem:[#allocation5 + $0x28] sm:$0xf0] %v854_v20 }
 0x40a   : > { %v781_v22 = vpop.permute.xlu0 %780 }
 0x40b   : > { %v873_v21 = vpop.permute.xlu1 %872  ;;  %v784_v23 = vsel %vm1933_vm7, %v779_v9, %v781_v22  ;;  %v785_v24 = vsel %vm1934_vm8, %v781_v22, %v783_v8  ;;  %v931_v39 = vld [vmem:[#allocation5] sm:$0xff] }
 0x40c   : > { %788 = vst [vmem:[#allocation5 + $0x10] sm:$0xf] %v784_v23  ;;  %789 = vst [vmem:[#allocation5 + $0x18] sm:$0xf] %v785_v24 }
 0x40e   : > { %v805_v26 = vpop.permute.xlu0 %804 }
 0x40f   : > { %v809_v25 = vpop.permute.xlu1 %808  ;;  %v810_v28 = vsel %vm1936_vm10, %v805_v26, %v807_v14 }
 0x410   : > { %v811_v27 = vsel %vm1935_vm9, %v807_v14, %v809_v25  ;;  %814 = vst [vmem:[#allocation5 + $0x10] sm:$0xf0] %v810_v28  ;;  %v936_v45 = vld [vmem:[#allocation5 + $0x28] sm:$0xff] }
 0x411   : > { %815 = vst [vmem:[#allocation5 + $0x18] sm:$0xf0] %v811_v27 }
 0x412   : > { %v848_v30 = vpop.permute.xlu0 %847 }
 0x413   : > { %v875_v29 = vpop.permute.xlu1 %874  ;;  %v853_v32 = vsel %vm1939_vm13, %v848_v30, %v850_v18 }
 0x414   : > { %v878_v1 = vsel %vm1937_vm11, %v873_v21, %v875_v29  ;;  %v879_v31 = vsel %vm1938_vm12, %v875_v29, %v877_v6  ;;  %857 = vst [vmem:[#allocation5 + $0x20] sm:$0xf0] %v853_v32 }
 0x415   : > { %882 = vst [vmem:[#allocation5 + $0x30] sm:$0xf] %v878_v1  ;;  %883 = vst [vmem:[#allocation5 + $0x38] sm:$0xf] %v879_v31 }
 0x416   : > { %v891_v34 = vpop.permute.xlu0 %890 }
 0x417   : > { %v918_v33 = vpop.permute.xlu1 %917  ;;  %v896_v37 = vsel %vm544_vm14, %v891_v34, %v893_v0  ;;  %v933_v40 = vld [vmem:[#allocation5 + $0x10] sm:$0xff]  ;;  %vm945_vm14 = vcmask 1044480  }
 0x418   : > { %v934_v36 = vld [vmem:[#allocation5 + $0x18] sm:$0xff]  ;;  %900 = vst [vmem:[#allocation5 + $0x30] sm:$0xf0] %v896_v37  ;;  %v1215_v41 = vpack.c.bf16 %v933_v40, %v931_v39 }
 0x419   : > { %v1213_v38 = vpack.c.bf16 %v934_v36, %v932_v35 }
 0x41a   : > { %v920_v43 = vpop.permute.xlu0 %919 }
 0x41b   : > { %v916_v42 = vpop.permute.xlu1 %915  ;;  %1214 = vmatprep.subr.bf16.mxu1 %v1213_v38  ;;  %v922_v47 = vsel %vm575_vm6, %v918_v33, %v920_v43  ;;  %v935_v49 = vld [vmem:[#allocation5 + $0x20] sm:$0xff] }
 0x41c   : > { %v921_v44 = vsel %vm575_vm6, %v916_v42, %v918_v33  ;;  %1216 = vmatpush1.bf16.msra.mxu1 %v1215_v41  ;;  %v938_v46 = vld [vmem:[#allocation5 + $0x38] sm:$0xff]  ;;  %926 = vst [vmem:[#allocation5 + $0x48] sm:$0xf] %v922_v47  ;;  %vm1940_vm6 = vcmask 1043456  }
 0x41d   : > { %925 = vst [vmem:[#allocation5 + $0x40] sm:$0xf] %v921_v44  ;;  %v1217_v48 = vpack.c.bf16 %v938_v46, %v936_v45  ;;  %vm1941_vm0 = vmmov %vm1940_vm6 }
 0x41e   : > { %vm1942_vm2 = vmmov %vm1941_vm0 }
 0x41f   : > { %1218 = vmatprep.subr.bf16.mxu1 %v1217_v48  ;;  %v937_v50 = vld [vmem:[#allocation5 + $0x30] sm:$0xff]  ;;  %vm1943_vm5 = vmmov %vm1941_vm0 }
 0x420   : > { %v1219_v51 = vpack.c.bf16 %v937_v50, %v935_v49 }
 0x422   : > { %1220 = vmatpush1.bf16.msra.mxu1 %v1219_v51 }
 0x423   : > { %v940_v52 = vld [vmem:[#allocation5 + $0x48] sm:$0x1f] }
 0x424   : > { %v939_v53 = vld [vmem:[#allocation5 + $0x40] sm:$0x1f]  ;;  %1180 = vmatprep.subr.msk.mxu1 %vm945_vm14, %v940_v52 }
 0x426   : > { %1181 = vmatpush1.msk.msra.mxu1 %vm945_vm14, %v939_v53 }
 0x427   : > { %1182 = vmatmul.mubr.msk.f32.vlgmr.msra.gmra.mrb[0].mxu1 %vm941_vm15, %v930_v54 }
 0x4fa   : > { %v1018_v55 = vpop.f32.mrb[0].mxu1 }
 0x4fb   : > { %v1028_v56 = vmul.f32 %v1018_v55, %v1018_v55  ;;  %v1020_v57 = vpop.f32.mrb[1].mxu1  ;;  %v1023_v58 = vsel %vm1940_vm6, %v1018_v55, 0.0 }
 0x4fc   : > { %v1024_v59 = vsel %vm1941_vm0, %v1020_v57, 0.0  ;;  %v1029_v60 = vmul.f32 %v1020_v57, %v1020_v57 }
 0x4fd   : > { %v1025_v61 = vadd.f32 %v1024_v59, %v1023_v58  ;;  %v1030_v62 = vsel %vm1942_vm2, %v1028_v56, 0.0 }
 0x4fe   : > { %v1031_v63 = vsel %vm1943_vm5, %v1029_v60, 0.0 }
 0x4ff   : > { %1026 = vadd.xlane.f32.xlu0 %v1025_v61  ;;  %v1032_v0 = vadd.f32 %v1031_v63, %v1030_v62 }
 0x501   : > { %1033 = vadd.xlane.f32.xlu1 %v1032_v0 }
 0x58c   : > { %v1027_v2 = vpop.xlane.xlu0 %1026 }
 0x58d   : > { %v1035_v3 = vmul.f32 0.00390625, %v1027_v2 }
 0x58e   : > { %v1034_v4 = vpop.xlane.xlu1 %1033 }
 0x58f   : > { %v1036_v5 = vmul.f32 0.00390625, %v1034_v4  ;;  %v1037_v6 = vmul.f32 %v1035_v3, %v1035_v3  ;;  %v1039_v11 = vsub.f32 %v1018_v55, %v1035_v3  ;;  %v1040_v13 = vsub.f32 %v1020_v57, %v1035_v3 }
 0x591   : > { %v1038_v7 = vsub.f32 %v1036_v5, %v1037_v6 }
 0x593   : > { %v1041_v8 = vadd.f32 1e-05, %v1038_v7 }
 0x595   : > { %1297 = vrsqrt.f32 %v1041_v8 }
 0x59f   : > { %v1298_v9 = vpop.eup %1297 }
 0x5a0   : > { %v1043_v14 = vmul.f32 %v1298_v9, %v1039_v11  ;;  %v1044_v15 = vmul.f32 %v1298_v9, %v1040_v13 }
 0x5a2   : > { %vm1045_vm1 = vcmp.ge.f32.partialorder %v1043_v14, 0.0  ;;  %vm1046_vm3 = vcmp.ge.f32.partialorder %v1044_v15, 0.0  ;;  %v1047_v10 = vmul.f32 0.01, %v1043_v14  ;;  %v1048_v12 = vmul.f32 0.01, %v1044_v15 }
 0x5a4   : > { %v1049_v16 = vsel %vm1045_vm1, %v1043_v14, %v1047_v10  ;;  %v1050_v17 = vsel %vm1046_vm3, %v1044_v15, %v1048_v12 }
 0x5a5   : > { %v1053_v18 = vcombine.low %v1049_v16, %v1050_v17 }
 0x5a7   : > { %1055 = vst [vmem:[%s305_s7] sm:$0xff] %v1053_v18 }
 0x5a8   : > { %1372 = shalt.err (!%p1369_p1)
}
 0x5a9   : > { %s1373_s18 = scalar_lea.hbm %s1852_s29, 128  ;;  %s1377_s28 = scalar_lea.hbm %s1902_s6, 256 }
 0x5aa   : > { %p1374_p11 = scmp.ne.s32.totalorder %s1852_s29, %s1373_s18  ;;  %p1378_p4 = scmp.lt.u32.totalorder %s1852_s29, %s1902_s6 }
 0x5ab   : > { %p1379_p10 = scmp.lt.u32.totalorder %s1377_s28, %s1373_s18  ;;  %p1381_p13 = scmp.lt.u32.totalorder %s1373_s18, %s1852_s29 }
 0x5ac   : > { %p1375_p12 = pnand %p1374_p11, %p1944_p3 }
 0x5ad   : > { %p1380_p6 = por %p1379_p10, %p1378_p4 }
 0x5ae   : > { %p1376_p2 = pneg %p1375_p12 }
 0x5af   : > { %p1382_p7 = por %p1381_p13, %p1380_p6 }
 0x5b1   : > { %p1383_p5 = pnand %p1382_p7, %p1376_p2 }
 0x5b3   : > { %1386 = shalt.err (!%p1383_p5)
}
 0x5b4   : > { %1225 = dma.vmem_to_hbm [thread:$0]  (%p1944_p3), %s1854_s19, 128, %s1852_s29, %s1057_s25  }
 0x5b5 PF: > { %s1083_s7 = sand.u32 1, %s1417_s21   ;;  %p1945_p8 = scmp.ne.s32.totalorder %s1920_s10, 0 }
 0x5b6   : > { %p1946_p9 = scmp.ge.s32.totalorder %s1429_s24, 2  ;;  %s1084_s26 = scalar_lea.sflag [#allocation8], %s1083_s7 }
 0x5b8   : > { %p1235_p0 = pnand %p1946_p9, %p1945_p8 }
 0x5ba   : > { %1412 = dma.done.wait (!%p1235_p0), %s1084_s26, 128  }
 0x5bb   : > { %1414 = vsyncadd (!%p1235_p0), %s1084_s26, 4294967168  ;;  %p22_p1 = scmp.ge.s32.totalorder %s1511_s27, 4   ;;  %s1947_s21 = smov %s1421_s22 }
 0x5bc   : > { %s1948_s22 = smov %s1425_s23  ;;  %s1949_s23 = smov %s1523_s30 }
 0x5bd   : > { %s1950_s24 = smov %s1511_s27  ;;  %24 = sbr.rel (!%p22_p1) target bundleno = 7 (0x7), region = 104 }
 0x5c4   :  { %1089 = vsyncpa [#allocation7], 1 }
 0x5c5   :  { %1091 = vsyncpa [#allocation7 + $0x1], 1 }
 0x5c6   :  { %1092 = vsyncpa [#allocation10], 1 }
 0x5c7   :  { %1094 = vsyncpa [#allocation10 + $0x1], 1 }
 0x5c8   :  { %1095 = vsyncpa [#allocation8], 1 }
 0x5c9   :  { %1097 = vsyncpa [#allocation8 + $0x1], 1 }

</bundles_post_ra>
